<compile_context>
chip_gen: v6e
topology: v6e:2x2x1
jax: 0.10.0
libtpu: 0.0.40
codegen_flags: <defaults>
</compile_context>

<pallas_src>
import jax
import jax.numpy as jnp
from jax.experimental import pallas as pl
from jax.experimental.pallas import tpu as pltpu


def gnn_layer_kernel(adj_ref, x_ref, wt_ref, b_ref, out_ref, acc_ref):
    k = pl.program_id(1)

    @pl.when(k == 0)
    def _init():
        acc_ref[...] = jnp.zeros_like(acc_ref)

    # Sum-aggregation partial product: acc += A[i-tile, k-tile] @ X[k-tile, :].
    # adj is stored bf16 (exact 0/1) purely to halve HBM bytes; the upcast to
    # f32 is exact, and accumulation is f32.
    acc_ref[...] += jnp.dot(
        adj_ref[...].astype(jnp.float32),
        x_ref[...],
        preferred_element_type=jnp.float32,
    )

    # Epilogue: Linear (H @ W^T + b) applied once, after the full reduction.
    @pl.when(k == pl.num_programs(1) - 1)
    def _epilogue():
        y = jnp.dot(acc_ref[...], wt_ref[...],
                    preferred_element_type=jnp.float32)
        out_ref[...] = (y + b_ref[...]).astype(out_ref.dtype)


def _round_up(v, m):
    return ((v + m - 1) // m) * m


def gnn_layer(adj, x, weight, bias, *, tm=None, tk=None):
    """out = (A @ X) @ W^T + b.

    adj:    (N_dst, N_src) dense 0/1 adjacency, adj[dst, src] = 1 for edge src->dst
    x:      (N_src, in_feats) node features
    weight: (out_feats, in_feats), bias: (out_feats,)   -- nn.Linear params
    """
    n_dst, n_src = adj.shape
    in_feats = x.shape[1]
    out_feats = weight.shape[0]

    # Lane-dense / MXU-friendly feature dims (padding sliced off at the end).
    f_in = _round_up(in_feats, 128)
    f_out = _round_up(out_feats, 128)

    # Tile selection: dst rows (parallel axis) and src reduction axis.
    if tm is None:
        tm = 256 if n_dst > 256 else _round_up(n_dst, 8)
    if tk is None:
        tk = 256 if n_src > 256 else _round_up(n_src, 8)

    n_dst_p = _round_up(n_dst, tm)
    n_src_p = _round_up(n_src, tk)

    # TPU (8,128) layout constraints on the tiled blocks.
    assert tm % 8 == 0, "dst tile must be a multiple of 8 sublanes"
    assert tk % 128 == 0 or tk == n_src_p, "src tile must be lane-aligned or full-width"

    # Zero-padding is absorbing for both the sum-aggregation and the Linear.
    adj_p = jnp.zeros((n_dst_p, n_src_p), jnp.bfloat16)
    adj_p = adj_p.at[:n_dst, :n_src].set(adj.astype(jnp.bfloat16))
    x_p = jnp.zeros((n_src_p, f_in), jnp.float32)
    x_p = x_p.at[:n_src, :in_feats].set(x.astype(jnp.float32))
    wt_p = jnp.zeros((f_in, f_out), jnp.float32)
    wt_p = wt_p.at[:in_feats, :out_feats].set(weight.T.astype(jnp.float32))
    b_p = jnp.zeros((1, f_out), jnp.float32)
    b_p = b_p.at[0, :out_feats].set(bias.astype(jnp.float32))

    grid = (n_dst_p // tm, n_src_p // tk)

    # VMEM budget: double-buffered input tiles + resident weight/bias/output
    # tile + f32 accumulator scratch, with 2x headroom, capped for v7x (64 MiB).
    vmem_bytes = (
        2 * tm * tk * 2          # adj tiles (bf16), double-buffered
        + 2 * tk * f_in * 4      # x tiles (f32), double-buffered
        + 2 * f_in * f_out * 4   # resident W^T
        + 2 * f_out * 4          # resident bias
        + 2 * tm * f_out * 4     # output tile
        + tm * f_in * 4          # accumulator scratch
    )
    vmem_limit = int(min(max(2 * vmem_bytes, 16 << 20), 64 << 20))

    out_p = pl.pallas_call(
        gnn_layer_kernel,
        out_shape=jax.ShapeDtypeStruct((n_dst_p, f_out), jnp.float32),
        grid_spec=pltpu.PrefetchScalarGridSpec(
            num_scalar_prefetch=0,
            grid=grid,
            in_specs=[
                pl.BlockSpec((tm, tk), lambda i, k: (i, k)),       # adj tile
                pl.BlockSpec((tk, f_in), lambda i, k: (k, 0)),     # x tile
                pl.BlockSpec((f_in, f_out), lambda i, k: (0, 0)),  # W^T (resident)
                pl.BlockSpec((1, f_out), lambda i, k: (0, 0)),     # bias (resident)
            ],
            out_specs=pl.BlockSpec((tm, f_out), lambda i, k: (i, 0)),
            scratch_shapes=[pltpu.VMEM((tm, f_in), jnp.float32)],
        ),
        compiler_params=pltpu.CompilerParams(
            dimension_semantics=("parallel", "arbitrary"),
            vmem_limit_bytes=vmem_limit,
        ),
    )(adj_p, x_p, wt_p, b_p)

    # Slice off the row / lane padding.
    return out_p[:n_dst, :out_feats]


if __name__ == "__main__":
    import numpy as np

    # Small deterministic problem; tm=64 / tk=128 gives a (4, 2) grid so both
    # the parallel dst axis and the k-reduction accumulator/epilogue paths are
    # exercised.
    N, IN_FEATS, OUT_FEATS = 200, 32, 32

    key = jax.random.PRNGKey(0)
    k_adj, k_x, k_w, k_b = jax.random.split(key, 4)

    # Deterministic random directed graph (no self loops), dense adjacency.
    adj = (jax.random.uniform(k_adj, (N, N)) < 0.1).astype(jnp.float32)
    adj = adj * (1.0 - jnp.eye(N, dtype=jnp.float32))  # adj[dst, src]

    x = jax.random.normal(k_x, (N, IN_FEATS), dtype=jnp.float32)

    # nn.Linear(in_feats, out_feats) init: U(-1/sqrt(in), 1/sqrt(in))
    bound = 1.0 / (IN_FEATS ** 0.5)
    weight = jax.random.uniform(
        k_w, (OUT_FEATS, IN_FEATS), minval=-bound, maxval=bound, dtype=jnp.float32)
    bias = jax.random.uniform(
        k_b, (OUT_FEATS,), minval=-bound, maxval=bound, dtype=jnp.float32)

    out = gnn_layer(adj, x, weight, bias, tm=64, tk=128)
    out = jax.block_until_ready(out)

    # Host float64 reference of the same semantics.
    adj_np = np.asarray(adj, dtype=np.float64)
    x_np = np.asarray(x, dtype=np.float64)
    w_np = np.asarray(weight, dtype=np.float64)
    b_np = np.asarray(bias, dtype=np.float64)
    ref = (adj_np @ x_np) @ w_np.T + b_np

    assert out.shape == (N, OUT_FEATS)
    # Tolerance accommodates possible reduced-precision MXU product rounding;
    # any aggregation / Linear bug would be off by O(1).
    assert np.allclose(np.asarray(out, dtype=np.float64), ref,
                       atol=2e-2, rtol=2e-2), "mismatch vs reference"

    print("KERNEL_OK")
</pallas_src>

<mosaic_0001>
module attributes {stable_mosaic.version = 11 : i64} {
  func.func @gnn_layer_kernel(%arg0: i32, %arg1: i32, %arg2: memref<64x128xbf16, #tpu.memory_space<vmem>>, %arg3: memref<128x128xf32, #tpu.memory_space<vmem>>, %arg4: memref<128x128xf32, #tpu.memory_space<vmem>>, %arg5: memref<1x128xf32, #tpu.memory_space<vmem>>, %arg6: memref<64x128xf32, #tpu.memory_space<vmem>>, %arg7: memref<64x128xf32, #tpu.memory_space<vmem>>) attributes {dimension_semantics = [#tpu.dimension_semantics<parallel>, #tpu.dimension_semantics<arbitrary>], iteration_bounds = array<i64: 4, 2>, scalar_prefetch = 0 : i64, scratch_operands = 1 : i64, tpu.core_type = #tpu.core_type<tc>, window_params = [{transform_indices = @transform_0, window_bounds = array<i64: 64, 128>}, {transform_indices = @transform_1, window_bounds = array<i64: 128, 128>}, {pipeline_mode = #tpu.pipeline_mode<synchronous>, transform_indices = @transform_2, window_bounds = array<i64: 128, 128>}, {pipeline_mode = #tpu.pipeline_mode<synchronous>, transform_indices = @transform_3, window_bounds = array<i64: 1, 128>}, {transform_indices = @transform_4, window_bounds = array<i64: 64, 128>}]} {
    %c0_i32 = arith.constant 0 : i32
    %0 = arith.cmpi eq, %arg1, %c0_i32 : i32
    %1 = arith.extui %0 : i1 to i32
    %c0_i32_0 = arith.constant 0 : i32
    %2 = arith.cmpi ne, %1, %c0_i32_0 : i32
    scf.if %2 {
      %cst_9 = arith.constant 0.000000e+00 : f32
      %13 = vector.broadcast %cst_9 : f32 to vector<64x128xf32>
      %c0_10 = arith.constant 0 : index
      %c0_11 = arith.constant 0 : index
      %14 = vector.load %arg7[%c0_10, %c0_11] : memref<64x128xf32, #tpu.memory_space<vmem>>, vector<64x128xf32>
      tpu.vector_store %arg7[%c0_10, %c0_11], %13 {strides = array<i32>} : memref<64x128xf32, #tpu.memory_space<vmem>>, vector<64x128xf32>,
    } else {
    }
    %c0 = arith.constant 0 : index
    %c0_1 = arith.constant 0 : index
    %3 = vector.load %arg7[%c0, %c0_1] : memref<64x128xf32, #tpu.memory_space<vmem>>, vector<64x128xf32>
    %c0_2 = arith.constant 0 : index
    %c0_3 = arith.constant 0 : index
    %4 = vector.load %arg2[%c0_2, %c0_3] : memref<64x128xbf16, #tpu.memory_space<vmem>>, vector<64x128xbf16>
    %5 = arith.extf %4 : vector<64x128xbf16> to vector<64x128xf32>
    %c0_4 = arith.constant 0 : index
    %c0_5 = arith.constant 0 : index
    %6 = vector.load %arg3[%c0_4, %c0_5] : memref<128x128xf32, #tpu.memory_space<vmem>>, vector<128x128xf32>
    %cst = arith.constant dense<0.000000e+00> : vector<64x128xf32>
    %7 = tpu.matmul %5, %6, %cst {dimension_numbers = #tpu.dot_dimension_numbers<[1], [0], [0], [1], [0, 0, 1, 1], [], []>} : vector<64x128xf32>, vector<128x128xf32>, vector<64x128xf32> -> vector<64x128xf32>
    %8 = arith.addf %3, %7 : vector<64x128xf32>
    %c0_6 = arith.constant 0 : index
    %c0_7 = arith.constant 0 : index
    %9 = vector.load %arg7[%c0_6, %c0_7] : memref<64x128xf32, #tpu.memory_space<vmem>>, vector<64x128xf32>
    tpu.vector_store %arg7[%c0_6, %c0_7], %8 {strides = array<i32>} : memref<64x128xf32, #tpu.memory_space<vmem>>, vector<64x128xf32>,
    %c1_i32 = arith.constant 1 : i32
    %10 = arith.cmpi eq, %arg1, %c1_i32 : i32
    %11 = arith.extui %10 : i1 to i32
    %c0_i32_8 = arith.constant 0 : i32
    %12 = arith.cmpi ne, %11, %c0_i32_8 : i32
    scf.if %12 {
      %c0_9 = arith.constant 0 : index
      %c0_10 = arith.constant 0 : index
      %13 = vector.load %arg7[%c0_9, %c0_10] : memref<64x128xf32, #tpu.memory_space<vmem>>, vector<64x128xf32>
      %c0_11 = arith.constant 0 : index
      %c0_12 = arith.constant 0 : index
      %14 = vector.load %arg4[%c0_11, %c0_12] : memref<128x128xf32, #tpu.memory_space<vmem>>, vector<128x128xf32>
      %cst_13 = arith.constant dense<0.000000e+00> : vector<64x128xf32>
      %15 = tpu.matmul %13, %14, %cst_13 {dimension_numbers = #tpu.dot_dimension_numbers<[1], [0], [0], [1], [0, 0, 1, 1], [], []>} : vector<64x128xf32>, vector<128x128xf32>, vector<64x128xf32> -> vector<64x128xf32>
      %c0_14 = arith.constant 0 : index
      %c0_15 = arith.constant 0 : index
      %16 = vector.load %arg5[%c0_14, %c0_15] : memref<1x128xf32, #tpu.memory_space<vmem>>, vector<1x128xf32>
      %17 = vector.broadcast %16 : vector<1x128xf32> to vector<64x128xf32>
      %18 = arith.addf %15, %17 : vector<64x128xf32>
      %c0_16 = arith.constant 0 : index
      %c0_17 = arith.constant 0 : index
      %19 = vector.load %arg6[%c0_16, %c0_17] : memref<64x128xf32, #tpu.memory_space<vmem>>, vector<64x128xf32>
      tpu.vector_store %arg6[%c0_16, %c0_17], %18 {strides = array<i32>} : memref<64x128xf32, #tpu.memory_space<vmem>>, vector<64x128xf32>,
    } else {
    }
    return
  }
  func.func @transform_0(%arg0: i32, %arg1: i32) -> (i32, i32) {
    %c0_i32 = arith.constant 0 : i32
    return %arg0, %arg1 : i32, i32
  }
  func.func @transform_1(%arg0: i32, %arg1: i32) -> (i32, i32) {
    %c0_i32 = arith.constant 0 : i32
    %c0_i32_0 = arith.constant 0 : i32
    return %arg1, %c0_i32 : i32, i32
  }
  func.func @transform_2(%arg0: i32, %arg1: i32) -> (i32, i32) {
    %c0_i32 = arith.constant 0 : i32
    %c0_i32_0 = arith.constant 0 : i32
    %c0_i32_1 = arith.constant 0 : i32
    return %c0_i32, %c0_i32_0 : i32, i32
  }
  func.func @transform_3(%arg0: i32, %arg1: i32) -> (i32, i32) {
    %c0_i32 = arith.constant 0 : i32
    %c0_i32_0 = arith.constant 0 : i32
    %c0_i32_1 = arith.constant 0 : i32
    return %c0_i32, %c0_i32_0 : i32, i32
  }
  func.func @transform_4(%arg0: i32, %arg1: i32) -> (i32, i32) {
    %c0_i32 = arith.constant 0 : i32
    %c0_i32_0 = arith.constant 0 : i32
    return %arg0, %c0_i32 : i32, i32
  }
}

</mosaic_0001>

<bundles_post_ra>
// kernel: tpu_custom_call.1
= control target key start
LH: loop header
LB: loop body
LE: loop exit
PB: predicated region body
PF: predicated region fallthrough
CT: control target
= control target key end

     0   :  { %s1752_s0 = inlined_call_operand.hbm [shape: bf16[256,256], index: 0, kind: input, shape index: {}]   ;;  %s1753_s1 = inlined_call_operand.hbm [shape: f32[256,128], index: 1, kind: input, shape index: {}]   ;;  %s1754_s2 = inlined_call_operand.hbm [shape: f32[128,128], index: 2, kind: input, shape index: {}]   ;;  %s1755_s3 = inlined_call_operand.vmem [shape: f32[1,128], index: 3, kind: input, shape index: {}]   ;;  %s1756_s4 = inlined_call_operand.hbm [shape: f32[256,128], index: 4, kind: output, shape index: {}]  }
   0x1   :  { %1778 = sst [smem:[#allocation25_spill]] %s1752_s0 }
   0x2   :  { %1779 = sst [smem:[#allocation26_spill]] %s1754_s2 }
   0x3   :  { %1780 = sst [smem:[#allocation27_spill]] %s1755_s3 }
   0x4   :  { %1781 = sst [smem:[#allocation28_spill]] %s1756_s4 }
   0x5   :  { %9 = vsyncpa [#allocation4], 0 }
   0x6   :  { %11 = vsyncpa [#allocation4 + $0x1], 0 }
   0x7   :  { %12 = vsyncpa [#allocation7], 0 }
   0x8   :  { %14 = vsyncpa [#allocation7 + $0x1], 0 }
   0x9   :  { %15 = vsyncpa [#allocation5], 0 }
   0xa   :  { %17 = vsyncpa [#allocation5 + $0x1], 0  ;;  %s1410_s15 = smov 0   ;;  %s1412_s16 = smov 0  }
   0xb   :  { %s1414_s17 = smov 0   ;;  %s1416_s18 = smov 0  }
   0xc   :  { %s1418_s19 = smov 0   ;;  %s1420_s20 = smov 0  }
   0xd   :  { %s1422_s21 = smov 0   ;;  %s1424_s22 = smov 0  }
   0xe   :  { %s1426_s23 = smov 0   ;;  %s1428_s24 = smov 0  }
   0xf   :  { %s1430_s25 = smov 0   ;;  %s1432_s26 = smov 0  }
  0x10   :  { %s1434_s27 = smov 0   ;;  %s1436_s28 = smov 0  }
  0x11 LB: > { %1782 = sst [smem:[#allocation14_spill]] %s1320_s15  ;;  %s1477_s29 = sadd.s32 4294967295, %s1372_s28   ;;  %s1372_s28 = sphi %s1436_s28, %s23_s28   ;;  %s1368_s27 = sphi %s1434_s27, %s1841_s27   ;;  %s1364_s26 = sphi %s1432_s26, %s1840_s26   ;;  %s1360_s25 = sphi %s1430_s25, %s1827_s25   ;;  %s1356_s24 = sphi %s1428_s24, %s1839_s24   ;;  %s1352_s23 = sphi %s1426_s23, %s1838_s23   ;;  %s1348_s22 = sphi %s1424_s22, %s1837_s22   ;;  %s1344_s21 = sphi %s1422_s21, %s1836_s21   ;;  %s1340_s20 = sphi %s1420_s20, %s1835_s20   ;;  %s1336_s19 = sphi %s1418_s19, %s1834_s19   ;;  %s1332_s18 = sphi %s1416_s18, %s1833_s18   ;;  %s1328_s17 = sphi %s1414_s17, %s1832_s17   ;;  %s1324_s16 = sphi %s1412_s16, %s1831_s16   ;;  %s1320_s15 = sphi %s1410_s15, %s1830_s15  }
  0x12   : > { %1783 = sst [smem:[#allocation15_spill]] %s1324_s16  ;;  %s743_s30 = sadd.s32 4294967294, %s1372_s28  }
  0x13   : > { %1784 = sst [smem:[#allocation16_spill]] %s1356_s24  ;;  %p57_p0 = scmp.ne.s32.totalorder %s1348_s22, %s1344_s21 }
  0x14   : > { %1785 = sst [smem:[#allocation17_spill]] %s1360_s25  ;;  %p1774_p1 = scmp.eq.s32.totalorder %s1477_s29, 0 }
  0x15   : > { %1786 = sst [smem:[#allocation18_spill]] %s1368_s27  ;;  %p83_p2 = scmp.ne.s32.totalorder %s1336_s19, %s1332_s18 }
  0x16   : > { %1787 = sst [smem:[#allocation19_spill]] %s1477_s29  ;;  %p1486_p3 = por %p1774_p1, %p57_p0 }
  0x17   : > { %p148_p4 = scmp.ne.s32.totalorder %s1328_s17, %s1324_s16  ;;  %p1494_p5 = por %p83_p2, %p1774_p1 }
  0x18   : > { %p149_p6 = scmp.eq.s32.totalorder %s1477_s29, 7  ;;  %p154_p7 = scmp.ne.s32.totalorder %s1324_s16, %s1320_s15 }
  0x19   : > { %s1789_s7 = scalar_select %p1494_p5, 1, 0 }
  0x1a   : > { %p155_p8 = scmp.eq.s32.totalorder %s743_s30, 7  ;;  %p1501_p9 = por %p149_p6, %p148_p4 }
  0x1b   : > { %1790 = sst [smem:[#allocation20_spill]] %s1789_s7  ;;  %p744_p10 = scmp.ge.s32.totalorder %s1372_s28, 1 }
  0x1c   : > { %s1791_s8 = scalar_select %p1501_p9, 1, 0 }
  0x1d   : > { %p1506_p11 = por %p155_p8, %p154_p7  ;;  %p162_p12 = scmp.lt.s32.totalorder %s1372_s28, 9 }
  0x1e   : > { %1792 = sst [smem:[#allocation21_spill]] %s1791_s8  ;;  %s1374_s11 = smov [#allocation8]  }
  0x1f   : > { %s1793_s9 = scalar_select %p1506_p11, 1, 0 }
  0x20   : > { %p1511_p13 = pnand %p744_p10, %p162_p12  ;;  %s174_s12 = sshll.u32 %s1374_s11, 4  ;;  %s175_s12 = int_to_ptr.vmem [resolvable:$true] %s174_s12 }
  0x21   : > { %1794 = sst [smem:[#allocation22_spill]] %s1793_s9  ;;  %s1149_s13 = scalar_lea.vmem %s175_s12, 2048 }
  0x22   : > { %p999_p0 = pneg %p1511_p13  ;;  %p1150_p6 = scmp.ne.s32.totalorder %s175_s12, %s1149_s13 }
  0x23   : > { %p1157_p9 = scmp.lt.s32.totalorder %s175_s12, %s175_s12  ;;  %p1158_p11 = scmp.lt.s32.totalorder %s1149_s13, %s1149_s13 }
  0x24   : > { %p1000_p2 = pnand %p999_p0, %p1774_p1 }
  0x25   : > { %p1159_p5 = por %p1158_p11, %p1157_p9 }
  0x26   : > { %p1140_p4 = pneg %p1000_p2 }
  0x28   : > { %p1152_p7 = pnand %p1150_p6, %p1140_p4 }
  0x2a   : > { %p1153_p8 = pneg %p1152_p7 }
  0x2c   : > { %p1160_p10 = pnand %p1159_p5, %p1153_p8 }
  0x2e   : > { %1163 = shalt.err (!%p1160_p10)
}
  0x2f   : > { %s1761_s14 = smov 128   ;;  %s1760_s18 = smov 8  }
  0x30   : > { %s1796_s2 = sld [smem:[#allocation26_spill]]  ;;  %s32_s11 = sadd.s32 1, %s1364_s26 }
  0x31   : > { %p33_p5 = scmp.ge.s32.totalorder %s32_s11, 2  ;;  %s35_s13 = sadd.s32 1, %s1368_s27 }
  0x32   : > { %s44_s5 = sadd.s32 1, %s1352_s23  ;;  %p51_p9 = scmp.ne.s32.totalorder %s1352_s23, %s1348_s22 }
  0x33   : > { %s1843_s11 = smov (%p33_p5, %s32_s11), 0  ;;  %s1845_s13 = smov (!%p33_p5, %s35_s13), %s1368_s27 }
  0x34   : > { %1797 = sst [smem:[#allocation23_spill]] %s1843_s11  ;;  %s1535_s9 = ssub.s32 %s1364_s26, %s1843_s11 }
  0x35   : > { %p1775_p11 = scmp.eq.s32.totalorder %s1372_s28, 0  ;;  %p37_p12 = scmp.ge.s32.totalorder %s1845_s13, 4 }
  0x36   : > { %1002 = dma.hbm_to_vmem [thread:$0]  (!%p1000_p2), %s1796_s2, 2048, %s175_s12, [#allocation7], %s1761_s14, %s1761_s14, %s1760_s18  }
  0x37   : > { %p68_p0 = scmp.eq.s32.totalorder %s1535_s9, 0  ;;  %p1541_p2 = por %p1775_p11, %p51_p9 }
  0x38   : > { %p1015_p4 = scmp.lt.s32.totalorder %s1372_s28, 8  ;;  %s1847_s13 = smov (%p37_p12, %s1845_s13), 0 }
  0x39   : > { %1799 = sst [smem:[#allocation24_spill]] %s1847_s13  ;;  %s191_s21 = sand.u32 1, %s1352_s23  }
  0x3a   : > { %s767_s30 = sshll.u32 %s1368_s27, 4  ;;  %s39_s18 = ssub.s32 %s1368_s27, %s1847_s13 }
  0x3b   : > { %s41_s14 = sor.u32 %s1535_s9, %s39_s18  ;;  %p136_p6 = scmp.eq.s32.totalorder %s39_s18, 0 }
  0x3c   : > { %p42_p7 = scmp.eq.s32.totalorder %s41_s14, 0  ;;  %s747_s2 = sshll.u32 %s191_s21, 5 }
  0x3d   : > { %s1800_s11 = sadd.s32 1, %s1328_s17  ;;  %s201_s8 = sadd.s32 %s1364_s26, %s767_s30 }
  0x3e   : > { %s1556_s15 = scalar_select %p136_p6, %s1328_s17, %s1800_s11  }
  0x3f   : > { %s1559_s4 = scalar_select %p42_p7, %s1352_s23, %s44_s5  }
  0x40   : > { %s750_s25 = sshll.u32 %s201_s8, 6  ;;  %s195_s3 = scalar_lea.vmem [#allocation3], %s747_s2 }
  0x41   : > { %s204_s24 = sshll.u32 %s195_s3, 4  ;;  %s1801_s0 = sld [smem:[#allocation25_spill]]  ;;  %s205_s24 = int_to_ptr.vmem [resolvable:$true] %s204_s24 }
  0x42   : > { %p1569_p8 = pnand %p1015_p4, %p1541_p2  ;;  %s192_s14 = scalar_lea.sflag [#allocation4], %s191_s21 }
  0x43   : > { %s1177_s5 = scalar_lea.vmem %s205_s24, 512  ;;  %s1377_s2 = smov [#allocation3]  }
  0x44   : > { %p1166_p10 = pneg %p1569_p8  ;;  %p1178_p5 = scmp.ne.s32.totalorder %s205_s24, %s1177_s5 }
  0x45   : > { %s1182_s3 = sshll.u32 %s1377_s2, 4  ;;  %s1183_s3 = int_to_ptr.vmem [resolvable:$false] %s1182_s3 }
  0x46   : > { %p1180_p9 = pnand %p1178_p5, %p1166_p10  ;;  %s1184_s16 = scalar_lea.vmem %s1183_s3, 1024 }
  0x47   : > { %s203_s29 = scalar_lea.hbm %s1801_s0, %s750_s25  ;;  %p1185_p6 = scmp.lt.s32.totalorder %s205_s24, %s1183_s3 }
  0x48   : > { %p1181_p12 = pneg %p1180_p9  ;;  %p1186_p7 = scmp.lt.s32.totalorder %s1184_s16, %s1177_s5 }
  0x4a   : > { %p1187_p1 = por %p1186_p7, %p1185_p6 }
  0x4c   : > { %p1188_p11 = pnand %p1187_p1, %p1181_p12 }
  0x4e   : > { %1191 = shalt.err (!%p1188_p11)
}
  0x4f   : > { %s1378_s25 = smov 64   ;;  %s1379_s7 = smov 4  }
  0x50   : > { %s1803_s8 = smov 128   ;;  %s70_s11 = sadd.s32 1, %s1340_s20 }
  0x51   : > { %1006 = dma.hbm_to_vmem [thread:$0]  (!%p1569_p8), %s203_s29, 512, %s205_s24, %s192_s14, %s1803_s8, %s1378_s25, %s1379_s7  }
  0x52   : > { %p77_p2 = scmp.ne.s32.totalorder %s1340_s20, %s1336_s19  ;;  %p1804_p1 = scmp.eq.s32.totalorder %s1372_s28, 0 }
  0x53   : > { %s1584_s12 = scalar_select %p68_p0, %s1340_s20, %s70_s11  }
  0x54   : > { %p79_p11 = por %p77_p2, %p1804_p1  ;;  %s214_s21 = sand.u32 1, %s1372_s28  }
  0x55   : > { %s216_s30 = sand.u32 1, %s1340_s20   ;;  %s768_s2 = sshll.u32 %s1364_s26, 11 }
  0x56   : > { %s751_s5 = sshll.u32 %s216_s30, 7  ;;  %s224_s0 = scalar_lea.hbm %s1753_s1, %s768_s2 }
  0x57   : > { %s218_s13 = scalar_lea.vmem [#allocation6], %s751_s5  ;;  %p1596_p10 = pnand %p1015_p4, %p79_p11 }
  0x58   : > { %s225_s27 = sshll.u32 %s218_s13, 4  ;;  %s215_s29 = scalar_lea.sflag [#allocation7], %s214_s21  ;;  %s226_s27 = int_to_ptr.vmem [resolvable:$true] %s225_s27 }
  0x59   : > { %p1194_p0 = pneg %p1596_p10  ;;  %s1205_s9 = scalar_lea.vmem %s226_s27, 2048 }
  0x5a   : > { %p1206_p8 = scmp.ne.s32.totalorder %s226_s27, %s1205_s9  ;;  %s1380_s18 = smov [#allocation6]  }
  0x5b   : > { %s1210_s14 = sshll.u32 %s1380_s18, 4  ;;  %s1211_s14 = int_to_ptr.vmem [resolvable:$false] %s1210_s14 }
  0x5c   : > { %p1208_p5 = pnand %p1206_p8, %p1194_p0  ;;  %s1212_s25 = scalar_lea.vmem %s1211_s14, 4096 }
  0x5d   : > { %p1213_p12 = scmp.lt.s32.totalorder %s226_s27, %s1211_s14  ;;  %p1214_p6 = scmp.lt.s32.totalorder %s1212_s25, %s1205_s9 }
  0x5e   : > { %p1209_p9 = pneg %p1208_p5 }
  0x5f   : > { %p1215_p7 = por %p1214_p6, %p1213_p12 }
  0x61   : > { %p1216_p4 = pnand %p1215_p7, %p1209_p9 }
  0x63   : > { %1219 = shalt.err (!%p1216_p4)
}
  0x64   : > { %s1806_s13 = smov 8   ;;  %237 = sbr.rel (%p1511_p13) target bundleno = 638 (0x27e), region = 36 }
  0x65   : > { %1009 = dma.hbm_to_vmem [thread:$0]  (!%p1596_p10), %s224_s0, 2048, %s226_s27, %s215_s29, %s1803_s8, %s1803_s8, %s1806_s13  }
  0x66   : > { %s239_s7 = sand.u32 (!%p1511_p13), 1, %s1348_s22  }
  0x67   : > { %s755_s11 = sshll.u32 (!%p1511_p13), %s239_s7, 5  ;;  %s240_s21 = scalar_lea.sflag (!%p1511_p13), [#allocation4], %s239_s7 }
  0x68   : > { %s1610_s30 = scalar_lea.vmem (!%p1511_p13), [#allocation3], %s755_s11 }
  0x69   : > { %1303 = dma.done.wait (%p1486_p3), %s240_s21, 512  }
  0x6a   : > { %1305 = vsyncadd (%p1486_p3), %s240_s21, 4294966784  ;;  %s1807_s5 = sld [smem:[#allocation19_spill]]  ;;  %s250_s0 = sand.u32 1, %s1336_s19  }
  0x6b   : > { %s1808_s2 = sld [smem:[#allocation20_spill]]  ;;  %s756_s27 = sshll.u32 %s250_s0, 7 }
  0x6c   : > { %s1618_s8 = scalar_lea.vmem [#allocation6], %s756_s27 }
  0x70   : > { %s248_s3 = sand.u32 1, %s1807_s5  }
  0x71   : > { %s249_s10 = scalar_lea.sflag [#allocation7], %s248_s3  ;;  %p1809_p13 = scmp.ne.s32.totalorder %s1808_s2, 0 }
  0x73   : > { %1307 = dma.done.wait (%p1809_p13), %s249_s10, 2048  }
  0x74   : > { %1309 = vsyncadd (%p1809_p13), %s249_s10, 4294965248  ;;  %p1810_p2 = scmp.eq.s32.totalorder %s1807_s5, 0 }
  0x76   : > { %1311 = dma.done.wait (%p1810_p2), [#allocation7], 2048   ;;  %p1811_p1 = pmov %p1810_p2 }
  0x77   : > { %s1812_s6 = sld [smem:[#allocation15_spill]] }
  0x78   : > { %1313 = vsyncadd (%p1811_p1), [#allocation7], 4294965248  ;;  %s1813_s9 = sld [smem:[#allocation16_spill]] }
  0x7d   : > { %s283_s16 = sand.u32 1, %s1812_s6  }
  0x7e   : > { %s758_s24 = sshll.u32 %s283_s16, 6  ;;  %p759_p3 = scmp.ne.s32.totalorder %s1813_s9, 0 }
  0x7f   : > { %s1631_s29 = scalar_lea.vmem [#allocation9], %s758_s24 }
  0x80   : > { %292 = sbr.rel (%p759_p3) target bundleno = 138 (0x8a), region = 52 }
  0x85   : > { %v1381_v0 = vmov 0.0  }
  0x86   : > { %293 = vst [vmem:[#allocation2 + $0x30] sm:$0xff] %v1381_v0  ;;  %294 = vst [vmem:[#allocation2] sm:$0xff] %v1381_v0 }
  0x87   : > { %295 = vst [vmem:[#allocation2 + $0x18] sm:$0xff] %v1381_v0  ;;  %296 = vst [vmem:[#allocation2 + $0x10] sm:$0xff] %v1381_v0 }
  0x88   : > { %297 = vst [vmem:[#allocation2 + $0x8] sm:$0xff] %v1381_v0  ;;  %298 = vst [vmem:[#allocation2 + $0x20] sm:$0xff] %v1381_v0 }
  0x89   : > { %299 = vst [vmem:[#allocation2 + $0x28] sm:$0xff] %v1381_v0  ;;  %300 = vst [vmem:[#allocation2 + $0x38] sm:$0xff] %v1381_v0 }
  0x8a PF: > { %v340_v1 = vld [vmem:[%s1618_s8 + $0x78] sm:$0xff]  ;;  %v339_v2 = vld [vmem:[%s1618_s8 + $0x70] sm:$0xff]  ;;  %v338_v3 = vld [vmem:[%s1618_s8 + $0x68] sm:$0xff]  ;;  %s1814_s18 = sld [smem:[#allocation16_spill]] }
  0x8b   : > { %837 = vmatprep.subr.mxu0 %v340_v1  ;;  %925 = vmatprep.subr.mxu1 %v340_v1  ;;  %v337_v4 = vld [vmem:[%s1618_s8 + $0x60] sm:$0xff]  ;;  %v336_v5 = vld [vmem:[%s1618_s8 + $0x58] sm:$0xff]  ;;  %v335_v6 = vld [vmem:[%s1618_s8 + $0x50] sm:$0xff] }
  0x8c   : > { %838 = vmatpush3.msra.mxu0 %v340_v1  ;;  %941 = vmatpush3.msra.mxu1 %v340_v1  ;;  %v334_v7 = vld [vmem:[%s1618_s8 + $0x48] sm:$0xff]  ;;  %v333_v8 = vld [vmem:[%s1618_s8 + $0x40] sm:$0xff]  ;;  %v332_v9 = vld [vmem:[%s1618_s8 + $0x38] sm:$0xff] }
  0x8d   : > { %839 = vmatprep.subr.mxu0 %v339_v2  ;;  %926 = vmatprep.subr.mxu1 %v339_v2  ;;  %v331_v10 = vld [vmem:[%s1618_s8 + $0x30] sm:$0xff]  ;;  %v330_v11 = vld [vmem:[%s1618_s8 + $0x28] sm:$0xff]  ;;  %v329_v12 = vld [vmem:[%s1618_s8 + $0x20] sm:$0xff] }
  0x8e   : > { %840 = vmatpush3.msra.mxu0 %v339_v2  ;;  %942 = vmatpush3.msra.mxu1 %v339_v2  ;;  %v328_v13 = vld [vmem:[%s1618_s8 + $0x18] sm:$0xff]  ;;  %v327_v14 = vld [vmem:[%s1618_s8 + $0x10] sm:$0xff]  ;;  %v326_v15 = vld [vmem:[%s1618_s8 + $0x8] sm:$0xff] }
  0x8f   : > { %841 = vmatprep.subr.mxu0 %v338_v3  ;;  %927 = vmatprep.subr.mxu1 %v338_v3  ;;  %v771_v16 = vld [vmem:[%s1610_s30] sm:$0xff]   ;;  %v787_v17 = vld [vmem:[%s1610_s30 + $0x10] sm:$0xff]   ;;  %v786_v19 = vld [vmem:[%s1610_s30 + $0x8] sm:$0xff]  }
  0x90   : > { %842 = vmatpush3.msra.mxu0 %v338_v3  ;;  %943 = vmatpush3.msra.mxu1 %v338_v3  ;;  %v325_v18 = vld [vmem:[%s1618_s8] sm:$0xff]  ;;  %v788_v20 = vld [vmem:[%s1610_s30 + $0x18] sm:$0xff]   ;;  %v772_v21 = vunpack.c.l.bf16 %v771_v16  ;;  %v780_v22 = vunpack.c.l.bf16 %v787_v17  ;;  %v773_v23 = vunpack.c.h.bf16 %v771_v16  ;;  %v781_v24 = vunpack.c.h.bf16 %v787_v17  ;;  %v301_v33 = vld [vmem:[#allocation2 + $0x30] sm:$0xff]  ;;  %p760_p11 = scmp.ne.s32.totalorder %s1814_s18, 1 }
  0x91   : > { %843 = vmatprep.subr.mxu0 %v337_v4  ;;  %928 = vmatprep.subr.mxu1 %v337_v4  ;;  %v776_v25 = vunpack.c.l.bf16 %v786_v19  ;;  %v784_v26 = vunpack.c.l.bf16 %v788_v20  ;;  %v777_v27 = vunpack.c.h.bf16 %v786_v19  ;;  %v785_v28 = vunpack.c.h.bf16 %v788_v20  ;;  %v302_v29 = vld [vmem:[#allocation2] sm:$0xff]  ;;  %v305_v34 = vld [vmem:[#allocation2 + $0x8] sm:$0xff]  ;;  %v304_v39 = vld [vmem:[#allocation2 + $0x10] sm:$0xff]  ;;  %s1815_s13 = sld [smem:[#allocation27_spill]] (!%p760_p11) }
  0x92   : > { %844 = vmatpush3.msra.mxu0 %v337_v4  ;;  %944 = vmatpush3.msra.mxu1 %v337_v4  ;;  %v306_v30 = vld [vmem:[#allocation2 + $0x20] sm:$0xff]  ;;  %v308_v40 = vld [vmem:[#allocation2 + $0x38] sm:$0xff]  ;;  %v307_v46 = vld [vmem:[#allocation2 + $0x28] sm:$0xff] }
  0x93   : > { %845 = vmatprep.subr.mxu0 %v336_v5  ;;  %929 = vmatprep.subr.mxu1 %v336_v5  ;;  %v303_v45 = vld [vmem:[#allocation2 + $0x18] sm:$0xff] }
  0x94   : > { %846 = vmatpush3.msra.mxu0 %v336_v5  ;;  %945 = vmatpush3.msra.mxu1 %v336_v5 }
  0x95   : > { %847 = vmatprep.subr.mxu0 %v335_v6  ;;  %930 = vmatprep.subr.mxu1 %v335_v6 }
  0x96   : > { %848 = vmatpush3.msra.mxu0 %v335_v6  ;;  %946 = vmatpush3.msra.mxu1 %v335_v6 }
  0x97   : > { %849 = vmatprep.subr.mxu0 %v334_v7  ;;  %931 = vmatprep.subr.mxu1 %v334_v7 }
  0x98   : > { %850 = vmatpush3.msra.mxu0 %v334_v7  ;;  %947 = vmatpush3.msra.mxu1 %v334_v7 }
  0x99   : > { %851 = vmatprep.subr.mxu0 %v333_v8  ;;  %932 = vmatprep.subr.mxu1 %v333_v8 }
  0x9a   : > { %852 = vmatpush3.msra.mxu0 %v333_v8  ;;  %948 = vmatpush3.msra.mxu1 %v333_v8 }
  0x9b   : > { %853 = vmatprep.subr.mxu0 %v332_v9  ;;  %933 = vmatprep.subr.mxu1 %v332_v9 }
  0x9c   : > { %854 = vmatpush3.msra.mxu0 %v332_v9  ;;  %949 = vmatpush3.msra.mxu1 %v332_v9 }
  0x9d   : > { %855 = vmatprep.subr.mxu0 %v331_v10  ;;  %934 = vmatprep.subr.mxu1 %v331_v10 }
  0x9e   : > { %856 = vmatpush3.msra.mxu0 %v331_v10  ;;  %950 = vmatpush3.msra.mxu1 %v331_v10 }
  0x9f   : > { %857 = vmatprep.subr.mxu0 %v330_v11  ;;  %935 = vmatprep.subr.mxu1 %v330_v11 }
  0xa0   : > { %858 = vmatpush3.msra.mxu0 %v330_v11  ;;  %951 = vmatpush3.msra.mxu1 %v330_v11 }
  0xa1   : > { %859 = vmatprep.subr.mxu0 %v329_v12  ;;  %936 = vmatprep.subr.mxu1 %v329_v12 }
  0xa2   : > { %860 = vmatpush3.msra.mxu0 %v329_v12  ;;  %952 = vmatpush3.msra.mxu1 %v329_v12 }
  0xa3   : > { %861 = vmatprep.subr.mxu0 %v328_v13  ;;  %937 = vmatprep.subr.mxu1 %v328_v13 }
  0xa4   : > { %862 = vmatpush3.msra.mxu0 %v328_v13  ;;  %953 = vmatpush3.msra.mxu1 %v328_v13 }
  0xa5   : > { %863 = vmatprep.subr.mxu0 %v327_v14  ;;  %938 = vmatprep.subr.mxu1 %v327_v14 }
  0xa6   : > { %864 = vmatpush3.msra.mxu0 %v327_v14  ;;  %954 = vmatpush3.msra.mxu1 %v327_v14 }
  0xa7   : > { %865 = vmatprep.subr.mxu0 %v326_v15  ;;  %939 = vmatprep.subr.mxu1 %v326_v15 }
  0xa8   : > { %866 = vmatpush3.msra.mxu0 %v326_v15  ;;  %955 = vmatpush3.msra.mxu1 %v326_v15 }
  0xa9   : > { %867 = vmatprep.subr.mxu0 %v325_v18  ;;  %940 = vmatprep.subr.mxu1 %v325_v18 }
  0xaa   : > { %868 = vmatpush3.msra.mxu0 %v325_v18  ;;  %956 = vmatpush3.msra.mxu1 %v325_v18 }
  0xab   : > { %869 = vmatprep.mubr.f32.mxu0 %v772_v21  ;;  %875 = vmatprep.mubr.f32.mxu1 %v780_v22 }
  0xac   : > { %870 = vmatmul.mubr.f32.vlgmr.msra.gmra.mxu0 %v773_v23  ;;  %876 = vmatmul.mubr.f32.vlgmr.msra.gmra.mxu1 %v781_v24 }
  0xad   : > { %872 = vmatprep.mubr.f32.mxu0 %v776_v25  ;;  %878 = vmatprep.mubr.f32.mxu1 %v784_v26 }
  0xb0   : > { %873 = vmatmul.mubr.f32.gmra.mxu0 %v777_v27  ;;  %879 = vmatmul.mubr.f32.gmra.mxu1 %v785_v28 }
 0x16c   : > { %v871_v31 = vpop.f32.mrf.mxu0  ;;  %v877_v32 = vpop.f32.mrf.mxu1 }
 0x16d   : > { %v447_v35 = vadd.f32 %v871_v31, %v302_v29  ;;  %v451_v36 = vadd.f32 %v877_v32, %v306_v30 }
 0x16e   : > { %v407_v37 = vpop.f32.mrf.mxu0  ;;  %v427_v38 = vpop.f32.mrf.mxu1 }
 0x16f   : > { %455 = vst [vmem:[#allocation2] sm:$0xff] %v447_v35  ;;  %459 = vst [vmem:[#allocation2 + $0x20] sm:$0xff] %v451_v36  ;;  %v446_v41 = vadd.f32 %v407_v37, %v301_v33  ;;  %v450_v42 = vadd.f32 %v427_v38, %v305_v34 }
 0x170   : > { %v874_v43 = vpop.f32.mrf.mxu0  ;;  %v880_v44 = vpop.f32.mrf.mxu1 }
 0x171   : > { %454 = vst [vmem:[#allocation2 + $0x30] sm:$0xff] %v446_v41  ;;  %458 = vst [vmem:[#allocation2 + $0x8] sm:$0xff] %v450_v42  ;;  %v449_v47 = vadd.f32 %v874_v43, %v304_v39  ;;  %v453_v48 = vadd.f32 %v880_v44, %v308_v40  ;;  %465 = sbr.rel (%p760_p11) target bundleno = 610 (0x262), region = 56 }
 0x172   : > { %v417_v49 = vpop.f32.mrf.mxu0  ;;  %v437_v50 = vpop.f32.mrf.mxu1 }
 0x173   : > { %457 = vst [vmem:[#allocation2 + $0x10] sm:$0xff] %v449_v47  ;;  %461 = vst [vmem:[#allocation2 + $0x38] sm:$0xff] %v453_v48  ;;  %v448_v51 = vadd.f32 %v417_v49, %v303_v45  ;;  %v452_v52 = vadd.f32 %v437_v50, %v307_v46 }
 0x175   : > { %456 = vst [vmem:[#allocation2 + $0x18] sm:$0xff] %v448_v51  ;;  %460 = vst [vmem:[#allocation2 + $0x28] sm:$0xff] %v452_v52 }
 0x176   : > { %v489_v53 = vld [vmem:[#allocation8 + $0x78] sm:$0xff]  ;;  %v488_v54 = vld [vmem:[#allocation8 + $0x70] sm:$0xff]  ;;  %v487_v55 = vld [vmem:[#allocation8 + $0x68] sm:$0xff] }
 0x177   : > { %881 = vmatprep.subr.mxu0 %v489_v53  ;;  %957 = vmatprep.subr.mxu1 %v489_v53  ;;  %v486_v56 = vld [vmem:[#allocation8 + $0x60] sm:$0xff]  ;;  %v485_v57 = vld [vmem:[#allocation8 + $0x58] sm:$0xff]  ;;  %v484_v58 = vld [vmem:[#allocation8 + $0x50] sm:$0xff] }
 0x178   : > { %882 = vmatpush3.msra.mxu0 %v489_v53  ;;  %973 = vmatpush3.msra.mxu1 %v489_v53  ;;  %v483_v59 = vld [vmem:[#allocation8 + $0x48] sm:$0xff]  ;;  %v482_v60 = vld [vmem:[#allocation8 + $0x40] sm:$0xff]  ;;  %v481_v61 = vld [vmem:[#allocation8 + $0x38] sm:$0xff] }
 0x179   : > { %883 = vmatprep.subr.mxu0 %v488_v54  ;;  %958 = vmatprep.subr.mxu1 %v488_v54  ;;  %v480_v62 = vld [vmem:[#allocation8 + $0x30] sm:$0xff]  ;;  %v479_v63 = vld [vmem:[#allocation8 + $0x28] sm:$0xff]  ;;  %v478_v0 = vld [vmem:[#allocation8 + $0x20] sm:$0xff] }
 0x17a   : > { %884 = vmatpush3.msra.mxu0 %v488_v54  ;;  %974 = vmatpush3.msra.mxu1 %v488_v54  ;;  %v477_v1 = vld [vmem:[#allocation8 + $0x18] sm:$0xff]  ;;  %v476_v2 = vld [vmem:[#allocation8 + $0x10] sm:$0xff]  ;;  %v475_v3 = vld [vmem:[#allocation8 + $0x8] sm:$0xff] }
 0x17b   : > { %885 = vmatprep.subr.mxu0 %v487_v55  ;;  %959 = vmatprep.subr.mxu1 %v487_v55  ;;  %v474_v4 = vld [vmem:[#allocation8] sm:$0xff]  ;;  %v466_v5 = vld [vmem:[#allocation2 + $0x30] sm:$0xff]  ;;  %v470_v6 = vld [vmem:[#allocation2 + $0x8] sm:$0xff] }
 0x17c   : > { %886 = vmatpush3.msra.mxu0 %v487_v55  ;;  %975 = vmatpush3.msra.mxu1 %v487_v55  ;;  %v467_v7 = vld [vmem:[#allocation2] sm:$0xff]  ;;  %v468_v9 = vld [vmem:[#allocation2 + $0x18] sm:$0xff]  ;;  %v472_v10 = vld [vmem:[#allocation2 + $0x28] sm:$0xff] }
 0x17d   : > { %887 = vmatprep.subr.mxu0 %v486_v56  ;;  %960 = vmatprep.subr.mxu1 %v486_v56  ;;  %v471_v8 = vld [vmem:[#allocation2 + $0x20] sm:$0xff]  ;;  %v469_v11 = vld [vmem:[#allocation2 + $0x10] sm:$0xff]  ;;  %v473_v12 = vld [vmem:[#allocation2 + $0x38] sm:$0xff] }
 0x17e   : > { %888 = vmatpush3.msra.mxu0 %v486_v56  ;;  %976 = vmatpush3.msra.mxu1 %v486_v56  ;;  %v761_v13 = vld [vmem:[%s1815_s13] ss:$0 sm:$0xff] }
 0x17f   : > { %889 = vmatprep.subr.mxu0 %v485_v57  ;;  %961 = vmatprep.subr.mxu1 %v485_v57 }
 0x180   : > { %890 = vmatpush3.msra.mxu0 %v485_v57  ;;  %977 = vmatpush3.msra.mxu1 %v485_v57 }
 0x181   : > { %891 = vmatprep.subr.mxu0 %v484_v58  ;;  %962 = vmatprep.subr.mxu1 %v484_v58 }
 0x182   : > { %892 = vmatpush3.msra.mxu0 %v484_v58  ;;  %978 = vmatpush3.msra.mxu1 %v484_v58 }
 0x183   : > { %893 = vmatprep.subr.mxu0 %v483_v59  ;;  %963 = vmatprep.subr.mxu1 %v483_v59 }
 0x184   : > { %894 = vmatpush3.msra.mxu0 %v483_v59  ;;  %979 = vmatpush3.msra.mxu1 %v483_v59 }
 0x185   : > { %895 = vmatprep.subr.mxu0 %v482_v60  ;;  %964 = vmatprep.subr.mxu1 %v482_v60 }
 0x186   : > { %896 = vmatpush3.msra.mxu0 %v482_v60  ;;  %980 = vmatpush3.msra.mxu1 %v482_v60 }
 0x187   : > { %897 = vmatprep.subr.mxu0 %v481_v61  ;;  %965 = vmatprep.subr.mxu1 %v481_v61 }
 0x188   : > { %898 = vmatpush3.msra.mxu0 %v481_v61  ;;  %981 = vmatpush3.msra.mxu1 %v481_v61 }
 0x189   : > { %899 = vmatprep.subr.mxu0 %v480_v62  ;;  %966 = vmatprep.subr.mxu1 %v480_v62 }
 0x18a   : > { %900 = vmatpush3.msra.mxu0 %v480_v62  ;;  %982 = vmatpush3.msra.mxu1 %v480_v62 }
 0x18b   : > { %901 = vmatprep.subr.mxu0 %v479_v63  ;;  %967 = vmatprep.subr.mxu1 %v479_v63 }
 0x18c   : > { %902 = vmatpush3.msra.mxu0 %v479_v63  ;;  %983 = vmatpush3.msra.mxu1 %v479_v63 }
 0x18d   : > { %903 = vmatprep.subr.mxu0 %v478_v0  ;;  %968 = vmatprep.subr.mxu1 %v478_v0 }
 0x18e   : > { %904 = vmatpush3.msra.mxu0 %v478_v0  ;;  %984 = vmatpush3.msra.mxu1 %v478_v0 }
 0x18f   : > { %905 = vmatprep.subr.mxu0 %v477_v1  ;;  %969 = vmatprep.subr.mxu1 %v477_v1 }
 0x190   : > { %906 = vmatpush3.msra.mxu0 %v477_v1  ;;  %985 = vmatpush3.msra.mxu1 %v477_v1 }
 0x191   : > { %907 = vmatprep.subr.mxu0 %v476_v2  ;;  %970 = vmatprep.subr.mxu1 %v476_v2 }
 0x192   : > { %908 = vmatpush3.msra.mxu0 %v476_v2  ;;  %986 = vmatpush3.msra.mxu1 %v476_v2 }
 0x193   : > { %909 = vmatprep.subr.mxu0 %v475_v3  ;;  %971 = vmatprep.subr.mxu1 %v475_v3 }
 0x194   : > { %910 = vmatpush3.msra.mxu0 %v475_v3  ;;  %987 = vmatpush3.msra.mxu1 %v475_v3 }
 0x195   : > { %911 = vmatprep.subr.mxu0 %v474_v4  ;;  %972 = vmatprep.subr.mxu1 %v474_v4 }
 0x196   : > { %912 = vmatpush3.msra.mxu0 %v474_v4  ;;  %988 = vmatpush3.msra.mxu1 %v474_v4 }
 0x197   : > { %913 = vmatprep.mubr.f32.mxu0 %v466_v5  ;;  %919 = vmatprep.mubr.f32.mxu1 %v470_v6 }
 0x198   : > { %914 = vmatmul.mubr.f32.vlgmr.msra.gmra.mxu0 %v467_v7  ;;  %920 = vmatmul.mubr.f32.vlgmr.msra.gmra.mxu1 %v471_v8 }
 0x199   : > { %916 = vmatprep.mubr.f32.mxu0 %v468_v9  ;;  %922 = vmatprep.mubr.f32.mxu1 %v472_v10 }
 0x19c   : > { %917 = vmatmul.mubr.f32.gmra.mxu0 %v469_v11  ;;  %923 = vmatmul.mubr.f32.gmra.mxu1 %v473_v12 }
 0x258   : > { %v915_v14 = vpop.f32.mrf.mxu0  ;;  %v921_v15 = vpop.f32.mrf.mxu1 }
 0x259   : > { %v569_v16 = vadd.f32 %v915_v14, %v761_v13  ;;  %v589_v17 = vadd.f32 %v921_v15, %v761_v13 }
 0x25a   : > { %v563_v18 = vpop.f32.mrf.mxu0  ;;  %v583_v19 = vpop.f32.mrf.mxu1 }
 0x25b   : > { %603 = vst [vmem:[%s1631_s29 + $0x8] sm:$0xff] %v569_v16  ;;  %607 = vst [vmem:[%s1631_s29 + $0x28] sm:$0xff] %v589_v17  ;;  %v564_v20 = vadd.f32 %v761_v13, %v563_v18  ;;  %v584_v21 = vadd.f32 %v761_v13, %v583_v19 }
 0x25c   : > { %v918_v22 = vpop.f32.mrf.mxu0  ;;  %v924_v23 = vpop.f32.mrf.mxu1 }
 0x25d   : > { %602 = vst [vmem:[%s1631_s29] sm:$0xff] %v564_v20  ;;  %606 = vst [vmem:[%s1631_s29 + $0x20] sm:$0xff] %v584_v21  ;;  %v579_v24 = vadd.f32 %v918_v22, %v761_v13  ;;  %v599_v25 = vadd.f32 %v924_v23, %v761_v13 }
 0x25e   : > { %v573_v26 = vpop.f32.mrf.mxu0  ;;  %v593_v27 = vpop.f32.mrf.mxu1 }
 0x25f   : > { %605 = vst [vmem:[%s1631_s29 + $0x18] sm:$0xff] %v579_v24  ;;  %609 = vst [vmem:[%s1631_s29 + $0x38] sm:$0xff] %v599_v25  ;;  %v574_v28 = vadd.f32 %v761_v13, %v573_v26  ;;  %v594_v29 = vadd.f32 %v761_v13, %v593_v27 }
 0x261   : > { %604 = vst [vmem:[%s1631_s29 + $0x10] sm:$0xff] %v574_v28  ;;  %608 = vst [vmem:[%s1631_s29 + $0x30] sm:$0xff] %v594_v29 }
 0x262 PF: > { %s1816_s7 = sld [smem:[#allocation17_spill]]  ;;  %s624_s27 = sshll.u32 %s1631_s29, 4  ;;  %s1673_s27 = int_to_ptr.vmem [resolvable:$true] %s624_s27 }
 0x263   : > { %s1818_s21 = sld [smem:[#allocation21_spill]]  ;;  %s1677_s10 = scalar_lea.sflag [#allocation5], %s283_s16 }
 0x264   : > { %s1819_s3 = sld [smem:[#allocation28_spill]]  ;;  %s1220_s8 = scalar_lea.vmem %s1673_s27, 1024 }
 0x265   : > { %p1221_p10 = scmp.ne.s32.totalorder %s1673_s27, %s1220_s8  ;;  %s1382_s6 = smov [#allocation9]  }
 0x266   : > { %s1224_s24 = sshll.u32 %s1382_s6, 4  ;;  %s1225_s24 = int_to_ptr.vmem [resolvable:$false] %s1224_s24 }
 0x267   : > { %s1226_s9 = scalar_lea.vmem %s1225_s24, 2048  ;;  %p1227_p9 = scmp.lt.s32.totalorder %s1673_s27, %s1225_s24 }
 0x268   : > { %s769_s30 = sshll.u32 %s1816_s7, 10  ;;  %p1228_p12 = scmp.lt.s32.totalorder %s1226_s9, %s1220_s8 }
 0x269   : > { %p1820_p0 = scmp.ne.s32.totalorder %s1818_s21, 0 }
 0x26a   : > { %s1670_s0 = scalar_lea.hbm %s1819_s3, %s769_s30  ;;  %p1229_p6 = por %p1228_p12, %p1227_p9 }
 0x26b   : > { %p1222_p8 = pnand %p1221_p10, %p1820_p0 }
 0x26d   : > { %p1223_p5 = pneg %p1222_p8 }
 0x26f   : > { %p1230_p7 = pnand %p1229_p6, %p1223_p5 }
 0x271   : > { %1233 = shalt.err (!%p1230_p7)
}
 0x272   : > { %s1234_s16 = scalar_lea.hbm %s1670_s0, 1024  ;;  %s1238_s14 = scalar_lea.hbm %s1819_s3, 4096 }
 0x273   : > { %p1235_p4 = scmp.ne.s32.totalorder %s1670_s0, %s1234_s16  ;;  %p1239_p1 = scmp.lt.s32.totalorder %s1670_s0, %s1819_s3 }
 0x274   : > { %p1240_p3 = scmp.lt.s32.totalorder %s1238_s14, %s1234_s16 }
 0x275   : > { %p1236_p13 = pnand %p1235_p4, %p1820_p0 }
 0x276   : > { %p1241_p11 = por %p1240_p3, %p1239_p1 }
 0x277   : > { %p1237_p2 = pneg %p1236_p13 }
 0x279   : > { %p1242_p10 = pnand %p1241_p11, %p1237_p2 }
 0x27b   : > { %1245 = shalt.err (!%p1242_p10)
}
 0x27c   : > { %s1383_s7 = smov 128   ;;  %s1384_s11 = smov 8  }
 0x27d   : > { %997 = dma.vmem_to_hbm [thread:$0]  (%p1820_p0), %s1673_s27, 1024, %s1670_s0, %s1677_s10, %s1383_s7, %s1383_s7, %s1384_s11  }
 0x27e PF: > { %s1821_s30 = sld [smem:[#allocation14_spill]]  ;;  %p1017_p8 = scmp.ge.s32.totalorder %s1372_s28, 2 }
 0x27f   : > { %s1822_s5 = sld [smem:[#allocation22_spill]] }
 0x284   : > { %s639_s2 = sand.u32 1, %s1821_s30  }
 0x285   : > { %p1823_p5 = scmp.ne.s32.totalorder %s1822_s5, 0  ;;  %s640_s8 = scalar_lea.sflag [#allocation5], %s639_s2 }
 0x287   : > { %p1011_p9 = pnand %p1017_p8, %p1823_p5 }
 0x289   : > { %p1012_p12 = pneg %p1011_p9 }
 0x28b   : > { %1315 = dma.done.wait (%p1012_p12), %s640_s8, 1024  }
 0x28c   : > { %1317 = vsyncadd (%p1012_p12), %s640_s8, 4294966272  ;;  %s23_s28 = sadd.s32 1, %s1372_s28   ;;  %s1825_s21 = sld [smem:[#allocation15_spill]] }
 0x28d   : > { %p1705_p6 = scmp.ge.s32.totalorder %s23_s28, 10   ;;  %s1826_s0 = smov %s1556_s15 }
 0x28e   : > { %s1827_s25 = sld [smem:[#allocation18_spill]]  ;;  %s1831_s16 = smov %s1328_s17 }
 0x28f   : > { %s1828_s27 = sld [smem:[#allocation23_spill]]  ;;  %s1832_s17 = smov %s1826_s0 }
 0x290   : > { %s1829_s10 = sld [smem:[#allocation24_spill]]  ;;  %s1833_s18 = smov %s1336_s19 }
 0x291   : > { %s1834_s19 = smov %s1340_s20  ;;  %s1835_s20 = smov %s1584_s12 }
 0x292   : > { %s1830_s15 = smov %s1825_s21  ;;  %s1836_s21 = smov %s1348_s22 }
 0x293   : > { %s1837_s22 = smov %s1352_s23  ;;  %s1838_s23 = smov %s1559_s4 }
 0x294   : > { %s1839_s24 = smov %s1364_s26  ;;  %22 = sbr.rel (!%p1705_p6) target bundleno = 17 (0x11), region = 106 }
 0x295   : > { %s1840_s26 = smov %s1828_s27 }
 0x296   : > { %s1841_s27 = smov %s1829_s10 }
 0x299   :  { %645 = vsyncpa [#allocation4], 1 }
 0x29a   :  { %647 = vsyncpa [#allocation4 + $0x1], 1 }
 0x29b   :  { %648 = vsyncpa [#allocation7], 1 }
 0x29c   :  { %650 = vsyncpa [#allocation7 + $0x1], 1 }
 0x29d   :  { %651 = vsyncpa [#allocation5], 1 }
 0x29e   :  { %653 = vsyncpa [#allocation5 + $0x1], 1 }

</bundles_post_ra>
